<compile_context>
chip_gen: v5e
topology: v5e:2x2
jax: 0.10.0
libtpu: 0.0.40
codegen_flags: <defaults>
</compile_context>

<pallas_src>
import math

import jax
import jax.numpy as jnp
from jax.experimental import pallas as pl
from jax.experimental.pallas import tpu as pltpu


def _round_up(n, m):
    return ((n + m - 1) // m) * m


def _cdiv(a, b):
    return -(-a // b)


def _make_labelnet_kernel(code_lo, code_hi):
    """code columns of the packed slab are [code_lo, code_hi)."""

    def kernel(alpha_ref, x_ref, w1_ref, b1_ref, wb_ref, bb_ref, out_ref):
        x = x_ref[...]                                   # [TILE_B, label_dim]
        b1 = b1_ref[...].astype(jnp.float32)             # [1, H_pad]
        bb = bb_ref[...].astype(jnp.float32)             # [1, OUT_pad]

        # fc1 + relu  (MXU matmul, f32 accumulate; bias/relu on VPU in f32)
        feat = jnp.maximum(
            jnp.dot(x, w1_ref[...], preferred_element_type=jnp.float32) + b1,
            0.0)                                          # [TILE_B, H_pad] f32

        # fused fc2: packed = feat @ [I_H | W2 | W2 | 0] + [0 | b2 | b2 | 0]
        #          = [feat | hid | hid_pre_tanh | 0]      (one MXU matmul)
        packed = jnp.dot(feat.astype(wb_ref.dtype), wb_ref[...],
                         preferred_element_type=jnp.float32) + bb

        # code = tanh(alpha * hid), applied only to the code columns
        alpha = alpha_ref[0]
        col = jax.lax.broadcasted_iota(jnp.int32, packed.shape, 1)
        is_code = (col >= code_lo) & (col < code_hi)
        packed = jnp.where(is_code, jnp.tanh(alpha * packed), packed)

        out_ref[...] = packed.astype(out_ref.dtype)

    return kernel


def labelnet_forward(x, w1, b1, w2, b2, alpha, *,
                     compute_dtype=jnp.float32, out_dtype=None, tile_b=2048):
    """x: [B, label_dim]; w1: [label_dim, H]; b1: [1, H]; w2: [H, C]; b2: [1, C].
       Returns (feat [B,H], hid [B,C], code [B,C]) in out_dtype (default f32)."""
    if out_dtype is None:
        out_dtype = jnp.float32

    B, label_dim = x.shape
    H = w1.shape[1]
    C = w2.shape[1]

    H_pad = _round_up(H, 128)
    OUT = H + 2 * C                       # packed real columns: feat|hid|code
    OUT_pad = _round_up(OUT, 128)         # single lane-dense output slab

    # ---- batch tiling: large tiles, >=2 balanced (even) grid steps when
    # possible (v7x dual TensorCore), and small batch-remainder padding.
    B16 = _round_up(B, 16)
    max_tile = max(16, min(_round_up(tile_b, 16), B16))
    steps = _cdiv(B16, max_tile)
    if B16 >= 32:
        steps = max(steps, 2)
        if steps % 2:
            steps += 1

    in_isz = jnp.dtype(compute_dtype).itemsize
    out_isz = jnp.dtype(out_dtype).itemsize

    # ---- per-chip VMEM budget (leave headroom, esp. on v7x's 64 MiB)
    try:
        info = pltpu.get_tpu_info()
        phys = int(getattr(info, "vmem_capacity_bytes", 128 << 20))
    except Exception:
        phys = 128 << 20
    if phys <= (64 << 20):
        cap = 48 << 20                                    # v7x
    else:
        cap = min(phys - (28 << 20), 100 << 20)           # v5e / v6e

    def vmem_need(tb):
        tiles = 2 * tb * (label_dim * in_isz + OUT_pad * out_isz)  # dbl-buffered I/O
        weights = 2 * ((label_dim * H_pad + H_pad * OUT_pad) * in_isz
                       + (H_pad + OUT_pad) * 4)
        interm = tb * (H_pad + 2 * OUT_pad) * 4                    # live f32 values
        return tiles + weights + interm + (8 << 20)

    TILE_B = _round_up(_cdiv(B16, steps), 16)
    while vmem_need(TILE_B) > cap and TILE_B > 16:
        steps += 2 if B16 >= 32 else 1
        TILE_B = _round_up(_cdiv(B16, steps), 16)
    B_pad = TILE_B * steps
    grid = (steps,)
    vmem_limit = int(min(max(vmem_need(TILE_B), 16 << 20), cap))

    # ---- operand prep (zero padding keeps the real columns exact)
    xp = x if B_pad == B else jnp.pad(x, ((0, B_pad - B), (0, 0)))
    xp = xp.astype(compute_dtype)

    w1p = jnp.pad(w1, ((0, 0), (0, H_pad - H))).astype(compute_dtype)
    b1p = jnp.pad(b1.reshape(1, -1), ((0, 0), (0, H_pad - H))).astype(jnp.float32)

    # fused second layer: W_big = [I_H | W2 | W2 | 0], b_big = [0 | b2 | b2 | 0]
    wbig = jnp.zeros((H_pad, OUT_pad), jnp.float32)
    wbig = wbig.at[:H, :H].set(jnp.eye(H, dtype=jnp.float32))
    wbig = wbig.at[:H, H:H + C].set(w2.astype(jnp.float32))
    wbig = wbig.at[:H, H + C:H + 2 * C].set(w2.astype(jnp.float32))
    wbig = wbig.astype(compute_dtype)
    bbig = jnp.zeros((1, OUT_pad), jnp.float32)
    bbig = bbig.at[:, H:H + C].set(b2.reshape(1, -1).astype(jnp.float32))
    bbig = bbig.at[:, H + C:H + 2 * C].set(b2.reshape(1, -1).astype(jnp.float32))

    alpha_arr = jnp.asarray(alpha, dtype=jnp.float32).reshape((1,))

    kernel = _make_labelnet_kernel(H + C, H + 2 * C)
    out_shape = jax.ShapeDtypeStruct((B_pad, OUT_pad), out_dtype)

    # index maps receive (grid indices..., scalar-prefetch refs...)
    tiled = lambda i, alpha_ref: (i, 0)     # x / packed output
    fixed = lambda i, alpha_ref: (0, 0)     # weights & biases (VMEM resident)

    def build_call(single_buffer_weights):
        wkw = {}
        if single_buffer_weights:
            # grid-invariant operands don't need double buffers
            wkw = dict(pipeline_mode=pl.Buffered(1))
        grid_spec = pltpu.PrefetchScalarGridSpec(
            num_scalar_prefetch=1,
            grid=grid,
            in_specs=[
                pl.BlockSpec((TILE_B, label_dim), tiled),        # x
                pl.BlockSpec((label_dim, H_pad), fixed, **wkw),  # w1
                pl.BlockSpec((1, H_pad), fixed, **wkw),          # b1
                pl.BlockSpec((H_pad, OUT_pad), fixed, **wkw),    # W_big
                pl.BlockSpec((1, OUT_pad), fixed, **wkw),        # b_big
            ],
            out_specs=pl.BlockSpec((TILE_B, OUT_pad), tiled),    # packed slab
        )
        return pl.pallas_call(
            kernel,
            out_shape=out_shape,
            grid_spec=grid_spec,
            compiler_params=pltpu.CompilerParams(
                dimension_semantics=("parallel",),
                vmem_limit_bytes=vmem_limit,
            ),
        )

    args = (alpha_arr, xp, w1p, b1p, wbig, bbig)
    try:
        packed = jax.block_until_ready(build_call(True)(*args))
    except Exception:
        # Fallback: installed jax may not accept pipeline_mode / Buffered(1).
        packed = build_call(False)(*args)

    packed = packed[:B]
    feat = packed[:, :H]
    hid = packed[:, H:H + C]
    code = packed[:, H + C:H + 2 * C]
    return feat, hid, code


class LabelNetParams:
    """Deterministic parameter setup mirroring nn.Linear init shapes."""

    def __init__(self, label_dim, code_len, key):
        hidden = (label_dim + code_len) // 2
        k1, k2, k3, k4 = jax.random.split(key, 4)
        bound1 = 1.0 / math.sqrt(label_dim)
        bound2 = 1.0 / math.sqrt(hidden)
        # stored as [in, out] (transposed from PyTorch's [out, in])
        self.w1 = jax.random.uniform(k1, (label_dim, hidden), jnp.float32,
                                     -bound1, bound1)
        self.b1 = jax.random.uniform(k2, (1, hidden), jnp.float32,
                                     -bound1, bound1)
        self.w2 = jax.random.uniform(k3, (hidden, code_len), jnp.float32,
                                     -bound2, bound2)
        self.b2 = jax.random.uniform(k4, (1, code_len), jnp.float32,
                                     -bound2, bound2)
        self.alpha = None

    def set_alpha(self, epoch):
        self.alpha = math.pow(1.0 * epoch + 1.0, 0.5)

    def __call__(self, x, compute_dtype=jnp.float32, out_dtype=None):
        return labelnet_forward(x, self.w1, self.b1, self.w2, self.b2,
                                self.alpha, compute_dtype=compute_dtype,
                                out_dtype=out_dtype)


if __name__ == "__main__":
    key = jax.random.PRNGKey(0)
    k_x, k_p = jax.random.split(key)

    batch = 8
    label_dim = 32
    code_len = 16
    hidden = (label_dim + code_len) // 2

    x = jax.random.normal(k_x, (batch, label_dim), jnp.float32)

    model = LabelNetParams(label_dim, code_len, k_p)
    model.set_alpha(epoch=3)   # alpha = sqrt(4) = 2.0

    # ---- pure-JAX reference ----
    feat_ref = jnp.maximum(x @ model.w1 + model.b1, 0.0)
    hid_ref = feat_ref @ model.w2 + model.b2
    code_ref = jnp.tanh(model.alpha * hid_ref)

    # ---- f32 path (tight check; feat tolerance slightly looser because it
    #      travels through the identity-passthrough MXU column block) ----
    feat, hid, code = model(x)
    jax.block_until_ready((feat, hid, code))

    assert feat.shape == (batch, hidden)
    assert hid.shape == (batch, code_len)
    assert code.shape == (batch, code_len)
    assert jnp.allclose(feat, feat_ref, atol=1e-4)
    assert jnp.allclose(hid, hid_ref, atol=1e-5)
    assert jnp.allclose(code, code_ref, atol=1e-5)

    # ---- bf16 compute + bf16 packed output (loose check) ----
    feat_b, hid_b, code_b = model(x, compute_dtype=jnp.bfloat16,
                                  out_dtype=jnp.bfloat16)
    jax.block_until_ready((feat_b, hid_b, code_b))
    assert feat_b.shape == (batch, hidden)
    assert jnp.allclose(feat_b.astype(jnp.float32), feat_ref, atol=5e-2, rtol=5e-2)
    assert jnp.allclose(hid_b.astype(jnp.float32), hid_ref, atol=5e-2, rtol=5e-2)
    assert jnp.allclose(code_b.astype(jnp.float32), code_ref, atol=5e-2, rtol=5e-2)

    print("KERNEL_OK")
</pallas_src>

<mosaic_0001>
module attributes {stable_mosaic.version = 11 : i64} {
  func.func @kernel(%arg0: i32, %arg1: memref<1xf32, #tpu.memory_space<smem>>, %arg2: memref<16x32xf32, #tpu.memory_space<vmem>>, %arg3: memref<32x128xf32, #tpu.memory_space<vmem>>, %arg4: memref<1x128xf32, #tpu.memory_space<vmem>>, %arg5: memref<128x128xf32, #tpu.memory_space<vmem>>, %arg6: memref<1x128xf32, #tpu.memory_space<vmem>>, %arg7: memref<16x128xf32, #tpu.memory_space<vmem>>) attributes {dimension_semantics = [#tpu.dimension_semantics<parallel>], iteration_bounds = array<i64: 1>, scalar_prefetch = 1 : i64, scratch_operands = 0 : i64, tpu.core_type = #tpu.core_type<tc>, window_params = [{transform_indices = @transform_0, window_bounds = array<i64: 16, 32>}, {pipeline_mode = #tpu.pipeline_mode<synchronous>, transform_indices = @transform_1, window_bounds = array<i64: 32, 128>}, {pipeline_mode = #tpu.pipeline_mode<synchronous>, transform_indices = @transform_2, window_bounds = array<i64: 1, 128>}, {pipeline_mode = #tpu.pipeline_mode<synchronous>, transform_indices = @transform_3, window_bounds = array<i64: 128, 128>}, {pipeline_mode = #tpu.pipeline_mode<synchronous>, transform_indices = @transform_4, window_bounds = array<i64: 1, 128>}, {transform_indices = @transform_5, window_bounds = array<i64: 16, 128>}]} {
    %c0 = arith.constant 0 : index
    %c0_0 = arith.constant 0 : index
    %0 = vector.load %arg2[%c0, %c0_0] : memref<16x32xf32, #tpu.memory_space<vmem>>, vector<16x32xf32>
    %c0_1 = arith.constant 0 : index
    %c0_2 = arith.constant 0 : index
    %1 = vector.load %arg4[%c0_1, %c0_2] : memref<1x128xf32, #tpu.memory_space<vmem>>, vector<1x128xf32>
    %c0_3 = arith.constant 0 : index
    %c0_4 = arith.constant 0 : index
    %2 = vector.load %arg6[%c0_3, %c0_4] : memref<1x128xf32, #tpu.memory_space<vmem>>, vector<1x128xf32>
    %c0_5 = arith.constant 0 : index
    %c0_6 = arith.constant 0 : index
    %3 = vector.load %arg3[%c0_5, %c0_6] : memref<32x128xf32, #tpu.memory_space<vmem>>, vector<32x128xf32>
    %cst = arith.constant dense<0.000000e+00> : vector<16x128xf32>
    %4 = tpu.matmul %0, %3, %cst {dimension_numbers = #tpu.dot_dimension_numbers<[1], [0], [0], [1], [0, 0, 1, 1], [], []>} : vector<16x32xf32>, vector<32x128xf32>, vector<16x128xf32> -> vector<16x128xf32>
    %5 = vector.broadcast %1 : vector<1x128xf32> to vector<16x128xf32>
    %6 = arith.addf %4, %5 : vector<16x128xf32>
    %cst_7 = arith.constant 0.000000e+00 : f32
    %7 = vector.broadcast %cst_7 : f32 to vector<16x128xf32>
    %8 = arith.maximumf %6, %7 : vector<16x128xf32>
    %c0_8 = arith.constant 0 : index
    %c0_9 = arith.constant 0 : index
    %9 = vector.load %arg5[%c0_8, %c0_9] : memref<128x128xf32, #tpu.memory_space<vmem>>, vector<128x128xf32>
    %cst_10 = arith.constant dense<0.000000e+00> : vector<16x128xf32>
    %10 = tpu.matmul %8, %9, %cst_10 {dimension_numbers = #tpu.dot_dimension_numbers<[1], [0], [0], [1], [0, 0, 1, 1], [], []>} : vector<16x128xf32>, vector<128x128xf32>, vector<16x128xf32> -> vector<16x128xf32>
    %11 = vector.broadcast %2 : vector<1x128xf32> to vector<16x128xf32>
    %12 = arith.addf %10, %11 : vector<16x128xf32>
    %c0_11 = arith.constant 0 : index
    %13 = memref.load %arg1[%c0_11] : memref<1xf32, #tpu.memory_space<smem>>
    %14 = tpu.iota {dimensions = array<i32: 1>} : vector<16x128xi32>
    %c40_i32 = arith.constant 40 : i32
    %15 = vector.broadcast %c40_i32 : i32 to vector<16x128xi32>
    %16 = arith.cmpi sge, %14, %15 : vector<16x128xi32>
    %c56_i32 = arith.constant 56 : i32
    %17 = vector.broadcast %c56_i32 : i32 to vector<16x128xi32>
    %18 = arith.cmpi slt, %14, %17 : vector<16x128xi32>
    %19 = arith.andi %16, %18 : vector<16x128xi1>
    %20 = vector.broadcast %13 : f32 to vector<16x128xf32>
    %21 = arith.mulf %20, %12 : vector<16x128xf32>
    %22 = math.tanh %21 : vector<16x128xf32>
    %23 = arith.select %19, %22, %12 : vector<16x128xi1>, vector<16x128xf32>
    %c0_12 = arith.constant 0 : index
    %c0_13 = arith.constant 0 : index
    %24 = vector.load %arg7[%c0_12, %c0_13] : memref<16x128xf32, #tpu.memory_space<vmem>>, vector<16x128xf32>
    tpu.vector_store %arg7[%c0_12, %c0_13], %23 {strides = array<i32>} : memref<16x128xf32, #tpu.memory_space<vmem>>, vector<16x128xf32>,
    return
  }
  func.func @transform_0(%arg0: i32, %arg1: memref<1xf32, #tpu.memory_space<smem>>) -> (i32, i32) {
    %c0_i32 = arith.constant 0 : i32
    %c0_i32_0 = arith.constant 0 : i32
    return %arg0, %c0_i32 : i32, i32
  }
  func.func @transform_1(%arg0: i32, %arg1: memref<1xf32, #tpu.memory_space<smem>>) -> (i32, i32) {
    %c0_i32 = arith.constant 0 : i32
    %c0_i32_0 = arith.constant 0 : i32
    %c0_i32_1 = arith.constant 0 : i32
    return %c0_i32, %c0_i32_0 : i32, i32
  }
  func.func @transform_2(%arg0: i32, %arg1: memref<1xf32, #tpu.memory_space<smem>>) -> (i32, i32) {
    %c0_i32 = arith.constant 0 : i32
    %c0_i32_0 = arith.constant 0 : i32
    %c0_i32_1 = arith.constant 0 : i32
    return %c0_i32, %c0_i32_0 : i32, i32
  }
  func.func @transform_3(%arg0: i32, %arg1: memref<1xf32, #tpu.memory_space<smem>>) -> (i32, i32) {
    %c0_i32 = arith.constant 0 : i32
    %c0_i32_0 = arith.constant 0 : i32
    %c0_i32_1 = arith.constant 0 : i32
    return %c0_i32, %c0_i32_0 : i32, i32
  }
  func.func @transform_4(%arg0: i32, %arg1: memref<1xf32, #tpu.memory_space<smem>>) -> (i32, i32) {
    %c0_i32 = arith.constant 0 : i32
    %c0_i32_0 = arith.constant 0 : i32
    %c0_i32_1 = arith.constant 0 : i32
    return %c0_i32, %c0_i32_0 : i32, i32
  }
  func.func @transform_5(%arg0: i32, %arg1: memref<1xf32, #tpu.memory_space<smem>>) -> (i32, i32) {
    %c0_i32 = arith.constant 0 : i32
    %c0_i32_0 = arith.constant 0 : i32
    return %arg0, %c0_i32 : i32, i32
  }
}

module attributes {stable_mosaic.version = 11 : i64} {
  func.func @kernel(%arg0: i32, %arg1: memref<1xf32, #tpu.memory_space<smem>>, %arg2: memref<16x32xf32, #tpu.memory_space<vmem>>, %arg3: memref<32x128xf32, #tpu.memory_space<vmem>>, %arg4: memref<1x128xf32, #tpu.memory_space<vmem>>, %arg5: memref<128x128xf32, #tpu.memory_space<vmem>>, %arg6: memref<1x128xf32, #tpu.memory_space<vmem>>, %arg7: memref<16x128xf32, #tpu.memory_space<vmem>>) attributes {dimension_semantics = [#tpu.dimension_semantics<parallel>], iteration_bounds = array<i64: 1>, scalar_prefetch = 1 : i64, scratch_operands = 0 : i64, tpu.core_type = #tpu.core_type<tc>, window_params = [{transform_indices = @transform_0, window_bounds = array<i64: 16, 32>}, {pipeline_mode = #tpu.pipeline_mode<synchronous>, transform_indices = @transform_1, window_bounds = array<i64: 32, 128>}, {pipeline_mode = #tpu.pipeline_mode<synchronous>, transform_indices = @transform_2, window_bounds = array<i64: 1, 128>}, {pipeline_mode = #tpu.pipeline_mode<synchronous>, transform_indices = @transform_3, window_bounds = array<i64: 128, 128>}, {pipeline_mode = #tpu.pipeline_mode<synchronous>, transform_indices = @transform_4, window_bounds = array<i64: 1, 128>}, {transform_indices = @transform_5, window_bounds = array<i64: 16, 128>}]} {
    %c0 = arith.constant 0 : index
    %c0_0 = arith.constant 0 : index
    %0 = vector.load %arg2[%c0, %c0_0] : memref<16x32xf32, #tpu.memory_space<vmem>>, vector<16x32xf32>
    %c0_1 = arith.constant 0 : index
    %c0_2 = arith.constant 0 : index
    %1 = vector.load %arg4[%c0_1, %c0_2] : memref<1x128xf32, #tpu.memory_space<vmem>>, vector<1x128xf32>
    %c0_3 = arith.constant 0 : index
    %c0_4 = arith.constant 0 : index
    %2 = vector.load %arg6[%c0_3, %c0_4] : memref<1x128xf32, #tpu.memory_space<vmem>>, vector<1x128xf32>
    %c0_5 = arith.constant 0 : index
    %c0_6 = arith.constant 0 : index
    %3 = vector.load %arg3[%c0_5, %c0_6] : memref<32x128xf32, #tpu.memory_space<vmem>>, vector<32x128xf32>
    %cst = arith.constant dense<0.000000e+00> : vector<16x128xf32>
    %4 = tpu.matmul %0, %3, %cst {dimension_numbers = #tpu.dot_dimension_numbers<[1], [0], [0], [1], [0, 0, 1, 1], [], []>} : vector<16x32xf32>, vector<32x128xf32>, vector<16x128xf32> -> vector<16x128xf32>
    %5 = vector.broadcast %1 : vector<1x128xf32> to vector<16x128xf32>
    %6 = arith.addf %4, %5 : vector<16x128xf32>
    %cst_7 = arith.constant 0.000000e+00 : f32
    %7 = vector.broadcast %cst_7 : f32 to vector<16x128xf32>
    %8 = arith.maximumf %6, %7 : vector<16x128xf32>
    %c0_8 = arith.constant 0 : index
    %c0_9 = arith.constant 0 : index
    %9 = vector.load %arg5[%c0_8, %c0_9] : memref<128x128xf32, #tpu.memory_space<vmem>>, vector<128x128xf32>
    %cst_10 = arith.constant dense<0.000000e+00> : vector<16x128xf32>
    %10 = tpu.matmul %8, %9, %cst_10 {dimension_numbers = #tpu.dot_dimension_numbers<[1], [0], [0], [1], [0, 0, 1, 1], [], []>} : vector<16x128xf32>, vector<128x128xf32>, vector<16x128xf32> -> vector<16x128xf32>
    %11 = vector.broadcast %2 : vector<1x128xf32> to vector<16x128xf32>
    %12 = arith.addf %10, %11 : vector<16x128xf32>
    %c0_11 = arith.constant 0 : index
    %13 = memref.load %arg1[%c0_11] : memref<1xf32, #tpu.memory_space<smem>>
    %14 = tpu.iota {dimensions = array<i32: 1>} : vector<16x128xi32>
    %c40_i32 = arith.constant 40 : i32
    %15 = vector.broadcast %c40_i32 : i32 to vector<16x128xi32>
    %16 = arith.cmpi sge, %14, %15 : vector<16x128xi32>
    %c56_i32 = arith.constant 56 : i32
    %17 = vector.broadcast %c56_i32 : i32 to vector<16x128xi32>
    %18 = arith.cmpi slt, %14, %17 : vector<16x128xi32>
    %19 = arith.andi %16, %18 : vector<16x128xi1>
    %20 = vector.broadcast %13 : f32 to vector<16x128xf32>
    %21 = arith.mulf %20, %12 : vector<16x128xf32>
    %22 = math.tanh %21 : vector<16x128xf32>
    %23 = arith.select %19, %22, %12 : vector<16x128xi1>, vector<16x128xf32>
    %c0_12 = arith.constant 0 : index
    %c0_13 = arith.constant 0 : index
    %24 = vector.load %arg7[%c0_12, %c0_13] : memref<16x128xf32, #tpu.memory_space<vmem>>, vector<16x128xf32>
    tpu.vector_store %arg7[%c0_12, %c0_13], %23 {strides = array<i32>} : memref<16x128xf32, #tpu.memory_space<vmem>>, vector<16x128xf32>,
    return
  }
  func.func @transform_0(%arg0: i32, %arg1: memref<1xf32, #tpu.memory_space<smem>>) -> (i32, i32) {
    %c0_i32 = arith.constant 0 : i32
    %c0_i32_0 = arith.constant 0 : i32
    return %arg0, %c0_i32 : i32, i32
  }
  func.func @transform_1(%arg0: i32, %arg1: memref<1xf32, #tpu.memory_space<smem>>) -> (i32, i32) {
    %c0_i32 = arith.constant 0 : i32
    %c0_i32_0 = arith.constant 0 : i32
    %c0_i32_1 = arith.constant 0 : i32
    return %c0_i32, %c0_i32_0 : i32, i32
  }
  func.func @transform_2(%arg0: i32, %arg1: memref<1xf32, #tpu.memory_space<smem>>) -> (i32, i32) {
    %c0_i32 = arith.constant 0 : i32
    %c0_i32_0 = arith.constant 0 : i32
    %c0_i32_1 = arith.constant 0 : i32
    return %c0_i32, %c0_i32_0 : i32, i32
  }
  func.func @transform_3(%arg0: i32, %arg1: memref<1xf32, #tpu.memory_space<smem>>) -> (i32, i32) {
    %c0_i32 = arith.constant 0 : i32
    %c0_i32_0 = arith.constant 0 : i32
    %c0_i32_1 = arith.constant 0 : i32
    return %c0_i32, %c0_i32_0 : i32, i32
  }
  func.func @transform_4(%arg0: i32, %arg1: memref<1xf32, #tpu.memory_space<smem>>) -> (i32, i32) {
    %c0_i32 = arith.constant 0 : i32
    %c0_i32_0 = arith.constant 0 : i32
    %c0_i32_1 = arith.constant 0 : i32
    return %c0_i32, %c0_i32_0 : i32, i32
  }
  func.func @transform_5(%arg0: i32, %arg1: memref<1xf32, #tpu.memory_space<smem>>) -> (i32, i32) {
    %c0_i32 = arith.constant 0 : i32
    %c0_i32_0 = arith.constant 0 : i32
    return %arg0, %c0_i32 : i32, i32
  }
}

</mosaic_0001>

<bundles_post_ra>
// kernel: tpu_custom_call.1
= control target key start
LH: loop header
LB: loop body
LE: loop exit
PB: predicated region body
PF: predicated region fallthrough
CT: control target
= control target key end

     0   :  { %12 = vsyncpa [#allocation5], 0  ;;  %s398_s0 = inlined_call_operand.<no memory space> [shape: f32[1], index: 0, kind: input, shape index: {}]   ;;  %s399_s1 = inlined_call_operand.hbm [shape: f32[16,32], index: 1, kind: input, shape index: {}]   ;;  %s400_s2 = inlined_call_operand.hbm [shape: f32[32,128], index: 2, kind: input, shape index: {}]   ;;  %s401_s3 = inlined_call_operand.vmem [shape: f32[1,128], index: 3, kind: input, shape index: {}]   ;;  %s402_s4 = inlined_call_operand.hbm [shape: f32[128,128], index: 4, kind: input, shape index: {}]   ;;  %s403_s5 = inlined_call_operand.vmem [shape: f32[1,128], index: 5, kind: input, shape index: {}]   ;;  %s404_s6 = inlined_call_operand.hbm [shape: f32[16,128], index: 6, kind: output, shape index: {}]  }
   0x1   :  { %13 = vsyncpa [#allocation8], 0 }
   0x2   :  { %14 = vsyncpa [#allocation6], 0  ;;  %s32_s23 = sshll.u32 %s400_s2, 4  ;;  %s322_s24 = smov [#allocation7]   ;;  %s33_s23 = int_to_ptr.hbm [resolvable:$true] %s32_s23 }
   0x3   :  { %s34_s25 = sshll.u32 %s322_s24, 4  ;;  %s19_s28 = sshll.u32 %s399_s1, 4  ;;  %s35_s25 = int_to_ptr.vmem [resolvable:$true] %s34_s25  ;;  %s20_s28 = int_to_ptr.hbm [resolvable:$true] %s19_s28 }
   0x4   :  { %s323_s29 = smov 128   ;;  %s324_s30 = smov 8  }
   0x5   :  { %40 = dma.hbm_to_vmem [thread:$0]  %s33_s23, 512, %s35_s25, [#allocation8], %s323_s29, %s323_s29, %s324_s30  }
   0x6   :  { %s325_s7 = smov [#allocation4]   ;;  %s47_s2 = sshll.u32 %s402_s4, 4  ;;  %s48_s2 = int_to_ptr.hbm [resolvable:$true] %s47_s2 }
   0x7   :  { %s21_s8 = sshll.u32 %s325_s7, 4  ;;  %s326_s1 = smov [#allocation9]   ;;  %s22_s8 = int_to_ptr.vmem [resolvable:$true] %s21_s8 }
   0x8   :  { %27 = dma.hbm_to_vmem [thread:$0]  %s20_s28, 256, %s22_s8, [#allocation5], %s323_s29, %s323_s29, %s324_s30  }
   0x9   :  { %s49_s11 = sshll.u32 %s326_s1, 4  ;;  %s50_s11 = int_to_ptr.vmem [resolvable:$true] %s49_s11 }
   0xa   :  { %55 = dma.hbm_to_vmem [thread:$0]  %s48_s2, 2048, %s50_s11, [#allocation8], %s323_s29, %s323_s29, %s324_s30  }
   0xb   :  { %316 = dma.done.wait [#allocation5], 256  }
   0xc   :  { %317 = vsyncadd [#allocation5], 4294967040 }
   0xd   :  { %318 = dma.done.wait [#allocation8], 2560  }
   0xe   :  { %319 = vsyncadd [#allocation8], 4294964736  ;;  %v77_v0 = vld [vmem:[#allocation7 + $0x18] sm:$0xff]  ;;  %v76_v1 = vld [vmem:[#allocation7 + $0x10] sm:$0xff]  ;;  %vm81_vm0 = vcmask 261120   ;;  %v156_v30 = vlaneseq  ;;  %v161_v32 = vstv %s398_s0  ;;  %s176_s0 = sshll.u32 %s404_s6, 4  ;;  %s177_s0 = int_to_ptr.hbm [resolvable:$true] %s176_s0 }
   0xf   :  { %100 = vmatpush.msra.mxu0 %v77_v0  ;;  %v75_v2 = vld [vmem:[#allocation7 + $0x8] sm:$0xff]  ;;  %v128_v3 = vld [vmem:[#allocation9 + $0x78] sm:$0xff]  ;;  %v127_v4 = vld [vmem:[#allocation9 + $0x70] sm:$0xff] }
  0x10   :  { %132 = vmatpush.msra.mxu1 %v128_v3  ;;  %v74_v5 = vld [vmem:[#allocation7] sm:$0xff]  ;;  %v126_v6 = vld [vmem:[#allocation9 + $0x68] sm:$0xff]  ;;  %192 = vmatpush.msra.mxu2 %v128_v3  ;;  %v70_v7 = vld [vmem:[#allocation4] sm:$0xff]  ;;  %v157_v34 = vand.u32 127, %v156_v30 }
  0x11   :  { %101 = vmatpush.msra.mxu0 %v76_v1  ;;  %v125_v8 = vld [vmem:[#allocation9 + $0x60] sm:$0xff]  ;;  %v124_v9 = vld [vmem:[#allocation9 + $0x58] sm:$0xff]  ;;  %v123_v10 = vld [vmem:[#allocation9 + $0x50] sm:$0xff] }
  0x12   :  { %133 = vmatpush.msra.mxu1 %v127_v4  ;;  %193 = vmatpush.msra.mxu2 %v127_v4  ;;  %v122_v11 = vld [vmem:[#allocation9 + $0x48] sm:$0xff]  ;;  %v71_v12 = vld [vmem:[#allocation4 + $0x8] sm:$0xff]  ;;  %v121_v13 = vld [vmem:[#allocation9 + $0x40] sm:$0xff]  ;;  %vm158_vm1 = vcmp.ge.s32.totalorder %v157_v34, 40  ;;  %vm159_vm2 = vcmp.lt.s32.totalorder %v157_v34, 56 }
  0x13   :  { %102 = vmatpush.msra.mxu0 %v75_v2  ;;  %v120_v14 = vld [vmem:[#allocation9 + $0x38] sm:$0xff]  ;;  %v119_v15 = vld [vmem:[#allocation9 + $0x30] sm:$0xff]  ;;  %v118_v16 = vld [vmem:[#allocation9 + $0x28] sm:$0xff] }
  0x14   :  { %134 = vmatpush.msra.mxu1 %v126_v6  ;;  %194 = vmatpush.msra.mxu2 %v126_v6  ;;  %v117_v17 = vld [vmem:[#allocation9 + $0x20] sm:$0xff]  ;;  %v116_v18 = vld [vmem:[#allocation9 + $0x18] sm:$0xff]  ;;  %v115_v19 = vld [vmem:[#allocation9 + $0x10] sm:$0xff] }
  0x15   :  { %103 = vmatpush.msra.mxu0 %v74_v5  ;;  %v114_v20 = vld [vmem:[#allocation9 + $0x8] sm:$0xff]  ;;  %v113_v21 = vld [vmem:[#allocation9] sm:$0xff]  ;;  %v214_v22 = vld [vmem:[%s401_s3] ss:$0 sm:$0xff]  ;;  %s327_s3 = smov [#allocation10]  }
  0x16   :  { %190 = vmatmul.msk.f32.vlgmr.msra.gmra.mxu0 %vm81_vm0, %v70_v7  ;;  %135 = vmatpush.msra.mxu1 %v125_v8  ;;  %v215_v29 = vld [vmem:[%s403_s5] ss:$0 sm:$0xff]  ;;  %vm160_vm3 = vmand %vm158_vm1, %vm159_vm2  ;;  %s174_s5 = sshll.u32 %s327_s3, 4  ;;  %s175_s5 = int_to_ptr.vmem [resolvable:$true] %s174_s5 }
  0x17   :  { %195 = vmatpush.msra.mxu2 %v125_v8 }
  0x18   :  { %136 = vmatpush.msra.mxu1 %v124_v9 }
  0x19   :  { %196 = vmatpush.msra.mxu2 %v124_v9 }
  0x1a   :  { %137 = vmatpush.msra.mxu1 %v123_v10 }
  0x1b   :  { %197 = vmatpush.msra.mxu2 %v123_v10 }
  0x1c   :  { %138 = vmatpush.msra.mxu1 %v122_v11 }
  0x1d   :  { %198 = vmatpush.msra.mxu2 %v122_v11 }
  0x1e   :  { %191 = vmatmul.msk.f32.gmra.mxu0 %vm81_vm0, %v71_v12  ;;  %139 = vmatpush.msra.mxu1 %v121_v13 }
  0x1f   :  { %199 = vmatpush.msra.mxu2 %v121_v13 }
  0x20   :  { %140 = vmatpush.msra.mxu1 %v120_v14 }
  0x21   :  { %200 = vmatpush.msra.mxu2 %v120_v14 }
  0x22   :  { %141 = vmatpush.msra.mxu1 %v119_v15 }
  0x23   :  { %201 = vmatpush.msra.mxu2 %v119_v15 }
  0x24   :  { %142 = vmatpush.msra.mxu1 %v118_v16 }
  0x25   :  { %202 = vmatpush.msra.mxu2 %v118_v16 }
  0x26   :  { %143 = vmatpush.msra.mxu1 %v117_v17 }
  0x27   :  { %203 = vmatpush.msra.mxu2 %v117_v17 }
  0x28   :  { %144 = vmatpush.msra.mxu1 %v116_v18 }
  0x29   :  { %204 = vmatpush.msra.mxu2 %v116_v18 }
  0x2a   :  { %145 = vmatpush.msra.mxu1 %v115_v19 }
  0x2b   :  { %205 = vmatpush.msra.mxu2 %v115_v19 }
  0x2c   :  { %146 = vmatpush.msra.mxu1 %v114_v20 }
  0x2d   :  { %206 = vmatpush.msra.mxu2 %v114_v20 }
  0x2e   :  { %147 = vmatpush.msra.mxu1 %v113_v21 }
  0x2f   :  { %207 = vmatpush.msra.mxu2 %v113_v21 }
  0x93   :  { %v105_v23 = vpop.f32.mrf.mxu0 }
  0x94   :  { %v106_v24 = vadd.f32 %v214_v22, %v105_v23 }
  0x96   :  { %v111_v25 = vmax.f32 %v106_v24, 0.0 }
  0x98   :  { %148 = vmatmul.f32.vlgmr.msra.gmra.mxu1 %v111_v25 }
  0x9b   :  { %v108_v26 = vpop.f32.mrf.mxu0 }
  0x9c   :  { %v109_v27 = vadd.f32 %v214_v22, %v108_v26 }
  0x9e   :  { %v112_v28 = vmax.f32 %v109_v27, 0.0 }
  0xa0   :  { %151 = vmatmul.f32.vlgmr.msra.gmra.mxu2 %v112_v28 }
 0x115   :  { %v149_v31 = vpop.f32.mrf.mxu1 }
 0x116   :  { %v150_v33 = vadd.f32 %v215_v29, %v149_v31 }
 0x118   :  { %v162_v35 = vmul.f32 %v161_v32, %v150_v33 }
 0x11a   :  { %216 = vtanh.f32 %v162_v35 }
 0x120   :  { %v217_v36 = vpop.eup %216 }
 0x121   :  { %v166_v37 = vsel %vm160_vm3, %v217_v36, %v150_v33 }
 0x122   :  { %168 = vst [vmem:[#allocation10] sm:$0xff] %v166_v37 }
 0x123   :  { %v152_v38 = vpop.f32.mrf.mxu2 }
 0x124   :  { %v153_v39 = vadd.f32 %v215_v29, %v152_v38 }
 0x126   :  { %v163_v40 = vmul.f32 %v161_v32, %v153_v39 }
 0x128   :  { %218 = vtanh.f32 %v163_v40 }
 0x12e   :  { %v219_v41 = vpop.eup %218 }
 0x12f   :  { %v167_v42 = vsel %vm160_vm3, %v219_v41, %v153_v39 }
 0x130   :  { %169 = vst [vmem:[#allocation10 + $0x8] sm:$0xff] %v167_v42 }
 0x131   :  { %182 = dma.vmem_to_hbm [thread:$0]  %s175_s5, 256, %s177_s0, [#allocation6], %s323_s29, %s323_s29, %s324_s30  }
 0x132   :  { %320 = dma.done.wait [#allocation6], 256  }
 0x133   :  { %321 = vsyncadd [#allocation6], 4294967040 }
 0x134   :  { %187 = vsyncpa [#allocation5], 1 }
 0x135   :  { %188 = vsyncpa [#allocation8], 1 }
 0x136   :  { %189 = vsyncpa [#allocation6], 1 }

// kernel: tpu_custom_call.1
= control target key start
LH: loop header
LB: loop body
LE: loop exit
PB: predicated region body
PF: predicated region fallthrough
CT: control target
= control target key end

     0   :  { %12 = vsyncpa [#allocation5], 0  ;;  %s398_s0 = inlined_call_operand.<no memory space> [shape: f32[1], index: 0, kind: input, shape index: {}]   ;;  %s399_s1 = inlined_call_operand.hbm [shape: f32[16,32], index: 1, kind: input, shape index: {}]   ;;  %s400_s2 = inlined_call_operand.hbm [shape: f32[32,128], index: 2, kind: input, shape index: {}]   ;;  %s401_s3 = inlined_call_operand.vmem [shape: f32[1,128], index: 3, kind: input, shape index: {}]   ;;  %s402_s4 = inlined_call_operand.hbm [shape: f32[128,128], index: 4, kind: input, shape index: {}]   ;;  %s403_s5 = inlined_call_operand.vmem [shape: f32[1,128], index: 5, kind: input, shape index: {}]   ;;  %s404_s6 = inlined_call_operand.hbm [shape: f32[16,128], index: 6, kind: output, shape index: {}]  }
   0x1   :  { %13 = vsyncpa [#allocation8], 0 }
   0x2   :  { %14 = vsyncpa [#allocation6], 0  ;;  %s32_s23 = sshll.u32 %s400_s2, 4  ;;  %s322_s24 = smov [#allocation7]   ;;  %s33_s23 = int_to_ptr.hbm [resolvable:$true] %s32_s23 }
   0x3   :  { %s34_s25 = sshll.u32 %s322_s24, 4  ;;  %s19_s28 = sshll.u32 %s399_s1, 4  ;;  %s35_s25 = int_to_ptr.vmem [resolvable:$true] %s34_s25  ;;  %s20_s28 = int_to_ptr.hbm [resolvable:$true] %s19_s28 }
   0x4   :  { %s323_s29 = smov 128   ;;  %s324_s30 = smov 8  }
   0x5   :  { %40 = dma.hbm_to_vmem [thread:$0]  %s33_s23, 512, %s35_s25, [#allocation8], %s323_s29, %s323_s29, %s324_s30  }
   0x6   :  { %s325_s7 = smov [#allocation4]   ;;  %s47_s2 = sshll.u32 %s402_s4, 4  ;;  %s48_s2 = int_to_ptr.hbm [resolvable:$true] %s47_s2 }
   0x7   :  { %s21_s8 = sshll.u32 %s325_s7, 4  ;;  %s326_s1 = smov [#allocation9]   ;;  %s22_s8 = int_to_ptr.vmem [resolvable:$true] %s21_s8 }
   0x8   :  { %27 = dma.hbm_to_vmem [thread:$0]  %s20_s28, 256, %s22_s8, [#allocation5], %s323_s29, %s323_s29, %s324_s30  }
   0x9   :  { %s49_s11 = sshll.u32 %s326_s1, 4  ;;  %s50_s11 = int_to_ptr.vmem [resolvable:$true] %s49_s11 }
   0xa   :  { %55 = dma.hbm_to_vmem [thread:$0]  %s48_s2, 2048, %s50_s11, [#allocation8], %s323_s29, %s323_s29, %s324_s30  }
   0xb   :  { %316 = dma.done.wait [#allocation5], 256  }
   0xc   :  { %317 = vsyncadd [#allocation5], 4294967040 }
   0xd   :  { %318 = dma.done.wait [#allocation8], 2560  }
   0xe   :  { %319 = vsyncadd [#allocation8], 4294964736  ;;  %v77_v0 = vld [vmem:[#allocation7 + $0x18] sm:$0xff]  ;;  %v76_v1 = vld [vmem:[#allocation7 + $0x10] sm:$0xff]  ;;  %vm81_vm0 = vcmask 261120   ;;  %v156_v30 = vlaneseq  ;;  %v161_v32 = vstv %s398_s0  ;;  %s176_s0 = sshll.u32 %s404_s6, 4  ;;  %s177_s0 = int_to_ptr.hbm [resolvable:$true] %s176_s0 }
   0xf   :  { %100 = vmatpush.msra.mxu0 %v77_v0  ;;  %v75_v2 = vld [vmem:[#allocation7 + $0x8] sm:$0xff]  ;;  %v128_v3 = vld [vmem:[#allocation9 + $0x78] sm:$0xff]  ;;  %v127_v4 = vld [vmem:[#allocation9 + $0x70] sm:$0xff] }
  0x10   :  { %132 = vmatpush.msra.mxu1 %v128_v3  ;;  %v74_v5 = vld [vmem:[#allocation7] sm:$0xff]  ;;  %v126_v6 = vld [vmem:[#allocation9 + $0x68] sm:$0xff]  ;;  %192 = vmatpush.msra.mxu2 %v128_v3  ;;  %v70_v7 = vld [vmem:[#allocation4] sm:$0xff]  ;;  %v157_v34 = vand.u32 127, %v156_v30 }
  0x11   :  { %101 = vmatpush.msra.mxu0 %v76_v1  ;;  %v125_v8 = vld [vmem:[#allocation9 + $0x60] sm:$0xff]  ;;  %v124_v9 = vld [vmem:[#allocation9 + $0x58] sm:$0xff]  ;;  %v123_v10 = vld [vmem:[#allocation9 + $0x50] sm:$0xff] }
  0x12   :  { %133 = vmatpush.msra.mxu1 %v127_v4  ;;  %193 = vmatpush.msra.mxu2 %v127_v4  ;;  %v122_v11 = vld [vmem:[#allocation9 + $0x48] sm:$0xff]  ;;  %v71_v12 = vld [vmem:[#allocation4 + $0x8] sm:$0xff]  ;;  %v121_v13 = vld [vmem:[#allocation9 + $0x40] sm:$0xff]  ;;  %vm158_vm1 = vcmp.ge.s32.totalorder %v157_v34, 40  ;;  %vm159_vm2 = vcmp.lt.s32.totalorder %v157_v34, 56 }
  0x13   :  { %102 = vmatpush.msra.mxu0 %v75_v2  ;;  %v120_v14 = vld [vmem:[#allocation9 + $0x38] sm:$0xff]  ;;  %v119_v15 = vld [vmem:[#allocation9 + $0x30] sm:$0xff]  ;;  %v118_v16 = vld [vmem:[#allocation9 + $0x28] sm:$0xff] }
  0x14   :  { %134 = vmatpush.msra.mxu1 %v126_v6  ;;  %194 = vmatpush.msra.mxu2 %v126_v6  ;;  %v117_v17 = vld [vmem:[#allocation9 + $0x20] sm:$0xff]  ;;  %v116_v18 = vld [vmem:[#allocation9 + $0x18] sm:$0xff]  ;;  %v115_v19 = vld [vmem:[#allocation9 + $0x10] sm:$0xff] }
  0x15   :  { %103 = vmatpush.msra.mxu0 %v74_v5  ;;  %v114_v20 = vld [vmem:[#allocation9 + $0x8] sm:$0xff]  ;;  %v113_v21 = vld [vmem:[#allocation9] sm:$0xff]  ;;  %v214_v22 = vld [vmem:[%s401_s3] ss:$0 sm:$0xff]  ;;  %s327_s3 = smov [#allocation10]  }
  0x16   :  { %190 = vmatmul.msk.f32.vlgmr.msra.gmra.mxu0 %vm81_vm0, %v70_v7  ;;  %135 = vmatpush.msra.mxu1 %v125_v8  ;;  %v215_v29 = vld [vmem:[%s403_s5] ss:$0 sm:$0xff]  ;;  %vm160_vm3 = vmand %vm158_vm1, %vm159_vm2  ;;  %s174_s5 = sshll.u32 %s327_s3, 4  ;;  %s175_s5 = int_to_ptr.vmem [resolvable:$true] %s174_s5 }
  0x17   :  { %195 = vmatpush.msra.mxu2 %v125_v8 }
  0x18   :  { %136 = vmatpush.msra.mxu1 %v124_v9 }
  0x19   :  { %196 = vmatpush.msra.mxu2 %v124_v9 }
  0x1a   :  { %137 = vmatpush.msra.mxu1 %v123_v10 }
  0x1b   :  { %197 = vmatpush.msra.mxu2 %v123_v10 }
  0x1c   :  { %138 = vmatpush.msra.mxu1 %v122_v11 }
  0x1d   :  { %198 = vmatpush.msra.mxu2 %v122_v11 }
  0x1e   :  { %191 = vmatmul.msk.f32.gmra.mxu0 %vm81_vm0, %v71_v12  ;;  %139 = vmatpush.msra.mxu1 %v121_v13 }
  0x1f   :  { %199 = vmatpush.msra.mxu2 %v121_v13 }
  0x20   :  { %140 = vmatpush.msra.mxu1 %v120_v14 }
  0x21   :  { %200 = vmatpush.msra.mxu2 %v120_v14 }
  0x22   :  { %141 = vmatpush.msra.mxu1 %v119_v15 }
  0x23   :  { %201 = vmatpush.msra.mxu2 %v119_v15 }
  0x24   :  { %142 = vmatpush.msra.mxu1 %v118_v16 }
  0x25   :  { %202 = vmatpush.msra.mxu2 %v118_v16 }
  0x26   :  { %143 = vmatpush.msra.mxu1 %v117_v17 }
  0x27   :  { %203 = vmatpush.msra.mxu2 %v117_v17 }
  0x28   :  { %144 = vmatpush.msra.mxu1 %v116_v18 }
  0x29   :  { %204 = vmatpush.msra.mxu2 %v116_v18 }
  0x2a   :  { %145 = vmatpush.msra.mxu1 %v115_v19 }
  0x2b   :  { %205 = vmatpush.msra.mxu2 %v115_v19 }
  0x2c   :  { %146 = vmatpush.msra.mxu1 %v114_v20 }
  0x2d   :  { %206 = vmatpush.msra.mxu2 %v114_v20 }
  0x2e   :  { %147 = vmatpush.msra.mxu1 %v113_v21 }
  0x2f   :  { %207 = vmatpush.msra.mxu2 %v113_v21 }
  0x93   :  { %v105_v23 = vpop.f32.mrf.mxu0 }
  0x94   :  { %v106_v24 = vadd.f32 %v214_v22, %v105_v23 }
  0x96   :  { %v111_v25 = vmax.f32 %v106_v24, 0.0 }
  0x98   :  { %148 = vmatmul.f32.vlgmr.msra.gmra.mxu1 %v111_v25 }
  0x9b   :  { %v108_v26 = vpop.f32.mrf.mxu0 }
  0x9c   :  { %v109_v27 = vadd.f32 %v214_v22, %v108_v26 }
  0x9e   :  { %v112_v28 = vmax.f32 %v109_v27, 0.0 }
  0xa0   :  { %151 = vmatmul.f32.vlgmr.msra.gmra.mxu2 %v112_v28 }
 0x115   :  { %v149_v31 = vpop.f32.mrf.mxu1 }
 0x116   :  { %v150_v33 = vadd.f32 %v215_v29, %v149_v31 }
 0x118   :  { %v162_v35 = vmul.f32 %v161_v32, %v150_v33 }
 0x11a   :  { %216 = vtanh.f32 %v162_v35 }
 0x120   :  { %v217_v36 = vpop.eup %216 }
 0x121   :  { %v166_v37 = vsel %vm160_vm3, %v217_v36, %v150_v33 }
 0x122   :  { %168 = vst [vmem:[#allocation10] sm:$0xff] %v166_v37 }
 0x123   :  { %v152_v38 = vpop.f32.mrf.mxu2 }
 0x124   :  { %v153_v39 = vadd.f32 %v215_v29, %v152_v38 }
 0x126   :  { %v163_v40 = vmul.f32 %v161_v32, %v153_v39 }
 0x128   :  { %218 = vtanh.f32 %v163_v40 }
 0x12e   :  { %v219_v41 = vpop.eup %218 }
 0x12f   :  { %v167_v42 = vsel %vm160_vm3, %v219_v41, %v153_v39 }
 0x130   :  { %169 = vst [vmem:[#allocation10 + $0x8] sm:$0xff] %v167_v42 }
 0x131   :  { %182 = dma.vmem_to_hbm [thread:$0]  %s175_s5, 256, %s177_s0, [#allocation6], %s323_s29, %s323_s29, %s324_s30  }
 0x132   :  { %320 = dma.done.wait [#allocation6], 256  }
 0x133   :  { %321 = vsyncadd [#allocation6], 4294967040 }
 0x134   :  { %187 = vsyncpa [#allocation5], 1 }
 0x135   :  { %188 = vsyncpa [#allocation8], 1 }
 0x136   :  { %189 = vsyncpa [#allocation6], 1 }

</bundles_post_ra>
